<compile_context>
chip_gen: v7x
topology: tpu7x:2x2x1
jax: 0.10.0
libtpu: 0.0.40
codegen_flags: <defaults>
</compile_context>

<pallas_src>
import jax
import jax.numpy as jnp
from jax.experimental import pallas as pl
from jax.experimental.pallas import tpu as pltpu


def _round_up(n, m):
    return ((n + m - 1) // m) * m


def _mlp_kernel(x_ref,
                w1_ref, b1_ref,
                w2_ref, b2_ref,
                w3_ref, b3_ref,
                w4_ref, b4_ref,
                w5_ref, b5_ref,
                o_ref):
    # Entire MLP fused in one kernel body: 5 MXU matmuls + VPU bias-add/ReLU.
    def layer(h, w_ref, b_ref, relu):
        # Cast activations to the weight dtype so bf16 weights give true bf16
        # MXU matmuls (no-op in the f32 path); accumulate in f32.
        h = jnp.dot(h.astype(w_ref.dtype), w_ref[...],
                    preferred_element_type=jnp.float32) + b_ref[...]
        return jnp.maximum(h, 0.0) if relu else h

    h = x_ref[...]
    h = layer(h, w1_ref, b1_ref, True)
    h = layer(h, w2_ref, b2_ref, True)
    h = layer(h, w3_ref, b3_ref, True)
    h = layer(h, w4_ref, b4_ref, True)
    h = layer(h, w5_ref, b5_ref, False)
    o_ref[...] = h.astype(o_ref.dtype)


def _pad2(a, rows, cols):
    r, c = a.shape
    return jnp.pad(a, ((0, rows - r), (0, cols - c)))


def classifier_forward(x, params, *, batch_tile=None, compute_dtype=jnp.float32):
    """Run the Classifier forward pass as a single fused Pallas kernel.

    x: (B, input_size) float32
    params: list of (W_t, b) pairs, W_t shape (in, out), b shape (1, out)
    """
    B, in_features = x.shape
    out_size = params[-1][0].shape[1]

    # --- batch tiling -------------------------------------------------------
    if batch_tile is None:
        # Multiple of 8 (f32 sublane); 1024 amortizes per-step overhead and
        # fills the MXU while staying tiny in VMEM.
        batch_tile = min(1024, _round_up(B, 8))
    batch_tile = max(8, _round_up(batch_tile, 8))
    padded_B = _round_up(B, batch_tile)
    grid = (padded_B // batch_tile,)

    # --- lane padding of all dims to multiples of 128 -----------------------
    dims = [in_features] + [w.shape[1] for (w, _) in params]
    pdims = [_round_up(d, 128) for d in dims]

    x_p = jnp.pad(x, ((0, padded_B - B), (0, pdims[0] - in_features)))

    flat_params = []
    in_specs = [pl.BlockSpec((batch_tile, pdims[0]), lambda i: (i, 0))]
    for li, (w, b) in enumerate(params):
        w_p = _pad2(w, pdims[li], pdims[li + 1]).astype(compute_dtype)
        b_p = _pad2(b, 1, pdims[li + 1]).astype(jnp.float32)  # bias add stays f32
        flat_params.append(w_p)
        flat_params.append(b_p)
        # Weights / biases are small (<1 MiB total): full arrays, constant
        # index_map -> DMA'd once, stay resident in VMEM for the whole grid.
        in_specs.append(pl.BlockSpec(w_p.shape, lambda i: (0, 0)))
        in_specs.append(pl.BlockSpec(b_p.shape, lambda i: (0, 0)))

    out_p = pdims[-1]
    out_spec = pl.BlockSpec((batch_tile, out_p), lambda i: (i, 0))

    # --- VMEM budget (explicit, with headroom; capped for v7x 64 MiB) -------
    act_bytes = batch_tile * sum(pdims[1:]) * 4
    io_bytes = 2 * 2 * batch_tile * max(pdims[0], out_p) * 4  # double-buffered x/out
    w_bytes = sum(int(p.size) * p.dtype.itemsize for p in flat_params)
    vmem_limit = int(min(64 << 20, max(16 << 20, 2 * (act_bytes + io_bytes + w_bytes))))

    # --- cost hint for the surrounding XLA schedule -------------------------
    flops = 2 * padded_B * sum(pdims[i] * pdims[i + 1] for i in range(len(pdims) - 1))
    bytes_accessed = (padded_B * pdims[0] * 4 + padded_B * out_p * 4 + w_bytes)
    cost = pl.CostEstimate(flops=flops, transcendentals=0,
                           bytes_accessed=bytes_accessed)

    out = pl.pallas_call(
        _mlp_kernel,
        out_shape=jax.ShapeDtypeStruct((padded_B, out_p), jnp.float32),
        grid_spec=pltpu.PrefetchScalarGridSpec(
            num_scalar_prefetch=0,
            grid=grid,
            in_specs=in_specs,
            out_specs=out_spec,
        ),
        compiler_params=pltpu.CompilerParams(
            dimension_semantics=("parallel",),
            vmem_limit_bytes=vmem_limit,
        ),
        cost_estimate=cost,
    )(x_p, *flat_params)

    # Slice back to the logical (B, out_size) result (lane-dense writeback
    # inside the kernel, cheap slice outside).
    return out[:B, :out_size]


def init_classifier_params(key, input_size, output_size):
    """Deterministic init mirroring nn.Linear's U(-1/sqrt(fan_in), 1/sqrt(fan_in))."""
    dims = [input_size, 128, 256, 128, 64, output_size]
    params = []
    for i in range(len(dims) - 1):
        fan_in, fan_out = dims[i], dims[i + 1]
        key, kw, kb = jax.random.split(key, 3)
        bound = 1.0 / jnp.sqrt(jnp.float32(fan_in))
        # Store transposed: (in, out)
        w_t = jax.random.uniform(kw, (fan_in, fan_out), jnp.float32, -bound, bound)
        b = jax.random.uniform(kb, (1, fan_out), jnp.float32, -bound, bound)
        params.append((w_t, b))
    return params


def classifier_reference(x, params):
    h = x
    for i, (w, b) in enumerate(params):
        h = h @ w + b
        if i < len(params) - 1:
            h = jnp.maximum(h, 0.0)
    return h


if __name__ == "__main__":
    input_size = 32
    output_size = 10

    key = jax.random.PRNGKey(0)
    key, kx = jax.random.split(key)

    params = init_classifier_params(key, input_size, output_size)

    # Small primary test (single-tile path).
    batch = 8
    x = jax.random.normal(kx, (batch, input_size), jnp.float32)
    logits = classifier_forward(x, params)
    logits = jax.block_until_ready(logits)
    ref = classifier_reference(x, params)
    assert logits.shape == (batch, output_size)
    assert jnp.allclose(logits, ref, atol=1e-4, rtol=1e-4), "mismatch vs reference"

    # Non-divisible batch with a multi-step grid (exercises padding + pipelining).
    key, kx2 = jax.random.split(key)
    x2 = jax.random.normal(kx2, (200, input_size), jnp.float32)
    logits2 = classifier_forward(x2, params, batch_tile=64)
    logits2 = jax.block_until_ready(logits2)
    ref2 = classifier_reference(x2, params)
    assert logits2.shape == (200, output_size)
    assert jnp.allclose(logits2, ref2, atol=1e-4, rtol=1e-4), "mismatch vs reference (tiled)"

    print("KERNEL_OK")
</pallas_src>

<mosaic_0001>
module attributes {stable_mosaic.version = 11 : i64} {
  func.func @_mlp_kernel(%arg0: i32, %arg1: memref<8x128xf32, #tpu.memory_space<vmem>>, %arg2: memref<128x128xf32, #tpu.memory_space<vmem>>, %arg3: memref<1x128xf32, #tpu.memory_space<vmem>>, %arg4: memref<128x256xf32, #tpu.memory_space<vmem>>, %arg5: memref<1x256xf32, #tpu.memory_space<vmem>>, %arg6: memref<256x128xf32, #tpu.memory_space<vmem>>, %arg7: memref<1x128xf32, #tpu.memory_space<vmem>>, %arg8: memref<128x128xf32, #tpu.memory_space<vmem>>, %arg9: memref<1x128xf32, #tpu.memory_space<vmem>>, %arg10: memref<128x128xf32, #tpu.memory_space<vmem>>, %arg11: memref<1x128xf32, #tpu.memory_space<vmem>>, %arg12: memref<8x128xf32, #tpu.memory_space<vmem>>) attributes {dimension_semantics = [#tpu.dimension_semantics<parallel>], iteration_bounds = array<i64: 1>, scalar_prefetch = 0 : i64, scratch_operands = 0 : i64, tpu.core_type = #tpu.core_type<tc>, window_params = [{transform_indices = @transform_0, window_bounds = array<i64: 8, 128>}, {pipeline_mode = #tpu.pipeline_mode<synchronous>, transform_indices = @transform_1, window_bounds = array<i64: 128, 128>}, {pipeline_mode = #tpu.pipeline_mode<synchronous>, transform_indices = @transform_2, window_bounds = array<i64: 1, 128>}, {pipeline_mode = #tpu.pipeline_mode<synchronous>, transform_indices = @transform_3, window_bounds = array<i64: 128, 256>}, {pipeline_mode = #tpu.pipeline_mode<synchronous>, transform_indices = @transform_4, window_bounds = array<i64: 1, 256>}, {pipeline_mode = #tpu.pipeline_mode<synchronous>, transform_indices = @transform_5, window_bounds = array<i64: 256, 128>}, {pipeline_mode = #tpu.pipeline_mode<synchronous>, transform_indices = @transform_6, window_bounds = array<i64: 1, 128>}, {pipeline_mode = #tpu.pipeline_mode<synchronous>, transform_indices = @transform_7, window_bounds = array<i64: 128, 128>}, {pipeline_mode = #tpu.pipeline_mode<synchronous>, transform_indices = @transform_8, window_bounds = array<i64: 1, 128>}, {pipeline_mode = #tpu.pipeline_mode<synchronous>, transform_indices = @transform_9, window_bounds = array<i64: 128, 128>}, {pipeline_mode = #tpu.pipeline_mode<synchronous>, transform_indices = @transform_10, window_bounds = array<i64: 1, 128>}, {transform_indices = @transform_11, window_bounds = array<i64: 8, 128>}]} {
    %c0 = arith.constant 0 : index
    %c0_0 = arith.constant 0 : index
    %0 = vector.load %arg1[%c0, %c0_0] : memref<8x128xf32, #tpu.memory_space<vmem>>, vector<8x128xf32>
    %c0_1 = arith.constant 0 : index
    %c0_2 = arith.constant 0 : index
    %1 = vector.load %arg2[%c0_1, %c0_2] : memref<128x128xf32, #tpu.memory_space<vmem>>, vector<128x128xf32>
    %cst = arith.constant dense<0.000000e+00> : vector<8x128xf32>
    %2 = tpu.matmul %0, %1, %cst {dimension_numbers = #tpu.dot_dimension_numbers<[1], [0], [0], [1], [0, 0, 1, 1], [], []>} : vector<8x128xf32>, vector<128x128xf32>, vector<8x128xf32> -> vector<8x128xf32>
    %c0_3 = arith.constant 0 : index
    %c0_4 = arith.constant 0 : index
    %3 = vector.load %arg3[%c0_3, %c0_4] : memref<1x128xf32, #tpu.memory_space<vmem>>, vector<1x128xf32>
    %4 = vector.broadcast %3 : vector<1x128xf32> to vector<8x128xf32>
    %5 = arith.addf %2, %4 : vector<8x128xf32>
    %cst_5 = arith.constant 0.000000e+00 : f32
    %6 = vector.broadcast %cst_5 : f32 to vector<8x128xf32>
    %7 = arith.maximumf %5, %6 : vector<8x128xf32>
    %c0_6 = arith.constant 0 : index
    %c0_7 = arith.constant 0 : index
    %8 = vector.load %arg4[%c0_6, %c0_7] : memref<128x256xf32, #tpu.memory_space<vmem>>, vector<128x256xf32>
    %cst_8 = arith.constant dense<0.000000e+00> : vector<8x256xf32>
    %9 = tpu.matmul %7, %8, %cst_8 {dimension_numbers = #tpu.dot_dimension_numbers<[1], [0], [0], [1], [0, 0, 1, 1], [], []>} : vector<8x128xf32>, vector<128x256xf32>, vector<8x256xf32> -> vector<8x256xf32>
    %c0_9 = arith.constant 0 : index
    %c0_10 = arith.constant 0 : index
    %10 = vector.load %arg5[%c0_9, %c0_10] : memref<1x256xf32, #tpu.memory_space<vmem>>, vector<1x256xf32>
    %11 = vector.broadcast %10 : vector<1x256xf32> to vector<8x256xf32>
    %12 = arith.addf %9, %11 : vector<8x256xf32>
    %cst_11 = arith.constant 0.000000e+00 : f32
    %13 = vector.broadcast %cst_11 : f32 to vector<8x256xf32>
    %14 = arith.maximumf %12, %13 : vector<8x256xf32>
    %c0_12 = arith.constant 0 : index
    %c0_13 = arith.constant 0 : index
    %15 = vector.load %arg6[%c0_12, %c0_13] : memref<256x128xf32, #tpu.memory_space<vmem>>, vector<256x128xf32>
    %cst_14 = arith.constant dense<0.000000e+00> : vector<8x128xf32>
    %16 = tpu.matmul %14, %15, %cst_14 {dimension_numbers = #tpu.dot_dimension_numbers<[1], [0], [0], [1], [0, 0, 1, 1], [], []>} : vector<8x256xf32>, vector<256x128xf32>, vector<8x128xf32> -> vector<8x128xf32>
    %c0_15 = arith.constant 0 : index
    %c0_16 = arith.constant 0 : index
    %17 = vector.load %arg7[%c0_15, %c0_16] : memref<1x128xf32, #tpu.memory_space<vmem>>, vector<1x128xf32>
    %18 = vector.broadcast %17 : vector<1x128xf32> to vector<8x128xf32>
    %19 = arith.addf %16, %18 : vector<8x128xf32>
    %cst_17 = arith.constant 0.000000e+00 : f32
    %20 = vector.broadcast %cst_17 : f32 to vector<8x128xf32>
    %21 = arith.maximumf %19, %20 : vector<8x128xf32>
    %c0_18 = arith.constant 0 : index
    %c0_19 = arith.constant 0 : index
    %22 = vector.load %arg8[%c0_18, %c0_19] : memref<128x128xf32, #tpu.memory_space<vmem>>, vector<128x128xf32>
    %cst_20 = arith.constant dense<0.000000e+00> : vector<8x128xf32>
    %23 = tpu.matmul %21, %22, %cst_20 {dimension_numbers = #tpu.dot_dimension_numbers<[1], [0], [0], [1], [0, 0, 1, 1], [], []>} : vector<8x128xf32>, vector<128x128xf32>, vector<8x128xf32> -> vector<8x128xf32>
    %c0_21 = arith.constant 0 : index
    %c0_22 = arith.constant 0 : index
    %24 = vector.load %arg9[%c0_21, %c0_22] : memref<1x128xf32, #tpu.memory_space<vmem>>, vector<1x128xf32>
    %25 = vector.broadcast %24 : vector<1x128xf32> to vector<8x128xf32>
    %26 = arith.addf %23, %25 : vector<8x128xf32>
    %cst_23 = arith.constant 0.000000e+00 : f32
    %27 = vector.broadcast %cst_23 : f32 to vector<8x128xf32>
    %28 = arith.maximumf %26, %27 : vector<8x128xf32>
    %c0_24 = arith.constant 0 : index
    %c0_25 = arith.constant 0 : index
    %29 = vector.load %arg10[%c0_24, %c0_25] : memref<128x128xf32, #tpu.memory_space<vmem>>, vector<128x128xf32>
    %cst_26 = arith.constant dense<0.000000e+00> : vector<8x128xf32>
    %30 = tpu.matmul %28, %29, %cst_26 {dimension_numbers = #tpu.dot_dimension_numbers<[1], [0], [0], [1], [0, 0, 1, 1], [], []>} : vector<8x128xf32>, vector<128x128xf32>, vector<8x128xf32> -> vector<8x128xf32>
    %c0_27 = arith.constant 0 : index
    %c0_28 = arith.constant 0 : index
    %31 = vector.load %arg11[%c0_27, %c0_28] : memref<1x128xf32, #tpu.memory_space<vmem>>, vector<1x128xf32>
    %32 = vector.broadcast %31 : vector<1x128xf32> to vector<8x128xf32>
    %33 = arith.addf %30, %32 : vector<8x128xf32>
    %c0_29 = arith.constant 0 : index
    %c0_30 = arith.constant 0 : index
    %34 = vector.load %arg12[%c0_29, %c0_30] : memref<8x128xf32, #tpu.memory_space<vmem>>, vector<8x128xf32>
    tpu.vector_store %arg12[%c0_29, %c0_30], %33 {strides = array<i32>} : memref<8x128xf32, #tpu.memory_space<vmem>>, vector<8x128xf32>,
    return
  }
  func.func @transform_0(%arg0: i32) -> (i32, i32) {
    %c0_i32 = arith.constant 0 : i32
    %c0_i32_0 = arith.constant 0 : i32
    return %arg0, %c0_i32 : i32, i32
  }
  func.func @transform_1(%arg0: i32) -> (i32, i32) {
    %c0_i32 = arith.constant 0 : i32
    %c0_i32_0 = arith.constant 0 : i32
    %c0_i32_1 = arith.constant 0 : i32
    return %c0_i32, %c0_i32_0 : i32, i32
  }
  func.func @transform_2(%arg0: i32) -> (i32, i32) {
    %c0_i32 = arith.constant 0 : i32
    %c0_i32_0 = arith.constant 0 : i32
    %c0_i32_1 = arith.constant 0 : i32
    return %c0_i32, %c0_i32_0 : i32, i32
  }
  func.func @transform_3(%arg0: i32) -> (i32, i32) {
    %c0_i32 = arith.constant 0 : i32
    %c0_i32_0 = arith.constant 0 : i32
    %c0_i32_1 = arith.constant 0 : i32
    return %c0_i32, %c0_i32_0 : i32, i32
  }
  func.func @transform_4(%arg0: i32) -> (i32, i32) {
    %c0_i32 = arith.constant 0 : i32
    %c0_i32_0 = arith.constant 0 : i32
    %c0_i32_1 = arith.constant 0 : i32
    return %c0_i32, %c0_i32_0 : i32, i32
  }
  func.func @transform_5(%arg0: i32) -> (i32, i32) {
    %c0_i32 = arith.constant 0 : i32
    %c0_i32_0 = arith.constant 0 : i32
    %c0_i32_1 = arith.constant 0 : i32
    return %c0_i32, %c0_i32_0 : i32, i32
  }
  func.func @transform_6(%arg0: i32) -> (i32, i32) {
    %c0_i32 = arith.constant 0 : i32
    %c0_i32_0 = arith.constant 0 : i32
    %c0_i32_1 = arith.constant 0 : i32
    return %c0_i32, %c0_i32_0 : i32, i32
  }
  func.func @transform_7(%arg0: i32) -> (i32, i32) {
    %c0_i32 = arith.constant 0 : i32
    %c0_i32_0 = arith.constant 0 : i32
    %c0_i32_1 = arith.constant 0 : i32
    return %c0_i32, %c0_i32_0 : i32, i32
  }
  func.func @transform_8(%arg0: i32) -> (i32, i32) {
    %c0_i32 = arith.constant 0 : i32
    %c0_i32_0 = arith.constant 0 : i32
    %c0_i32_1 = arith.constant 0 : i32
    return %c0_i32, %c0_i32_0 : i32, i32
  }
  func.func @transform_9(%arg0: i32) -> (i32, i32) {
    %c0_i32 = arith.constant 0 : i32
    %c0_i32_0 = arith.constant 0 : i32
    %c0_i32_1 = arith.constant 0 : i32
    return %c0_i32, %c0_i32_0 : i32, i32
  }
  func.func @transform_10(%arg0: i32) -> (i32, i32) {
    %c0_i32 = arith.constant 0 : i32
    %c0_i32_0 = arith.constant 0 : i32
    %c0_i32_1 = arith.constant 0 : i32
    return %c0_i32, %c0_i32_0 : i32, i32
  }
  func.func @transform_11(%arg0: i32) -> (i32, i32) {
    %c0_i32 = arith.constant 0 : i32
    %c0_i32_0 = arith.constant 0 : i32
    return %arg0, %c0_i32 : i32, i32
  }
}

</mosaic_0001>

<bundles_post_ra>
// kernel: tpu_custom_call.1
= control target key start
LH: loop header
LB: loop body
LE: loop exit
PB: predicated region body
PF: predicated region fallthrough
CT: control target
= control target key end

     0   :  { %16 = vsyncpa [#allocation3], 0  ;;  %s1379_s0 = inlined_call_operand.hbm [shape: f32[8,128], index: 0, kind: input, shape index: {}]   ;;  %s1380_s1 = inlined_call_operand.hbm [shape: f32[128,128], index: 1, kind: input, shape index: {}]   ;;  %s1381_s2 = inlined_call_operand.vmem [shape: f32[1,128], index: 2, kind: input, shape index: {}]   ;;  %s1382_s3 = inlined_call_operand.hbm [shape: f32[128,256], index: 3, kind: input, shape index: {}]   ;;  %s1383_s4 = inlined_call_operand.vmem [shape: f32[1,256], index: 4, kind: input, shape index: {}]   ;;  %s1384_s5 = inlined_call_operand.hbm [shape: f32[256,128], index: 5, kind: input, shape index: {}]   ;;  %s1385_s6 = inlined_call_operand.vmem [shape: f32[1,128], index: 6, kind: input, shape index: {}]   ;;  %s1386_s7 = inlined_call_operand.hbm [shape: f32[128,128], index: 7, kind: input, shape index: {}]   ;;  %s1387_s8 = inlined_call_operand.vmem [shape: f32[1,128], index: 8, kind: input, shape index: {}]   ;;  %s1388_s9 = inlined_call_operand.hbm [shape: f32[128,128], index: 9, kind: input, shape index: {}]   ;;  %s1389_s10 = inlined_call_operand.vmem [shape: f32[1,128], index: 10, kind: input, shape index: {}]   ;;  %s1390_s11 = inlined_call_operand.hbm [shape: f32[8,128], index: 11, kind: output, shape index: {}]  }
   0x1   :  { %17 = vsyncpa [#allocation6], 0 }
   0x2   :  { %18 = vsyncpa [#allocation9], 0 }
   0x3   :  { %19 = vsyncpa [#allocation12], 0 }
   0x4   :  { %20 = vsyncpa [#allocation4], 0  ;;  %s1156_s17 = smov [#allocation5]   ;;  %s992_s21 = scalar_lea.hbm %s1380_s1, 2048 }
   0x5   :  { %s36_s18 = sshll.u32 %s1156_s17, 4  ;;  %p993_p0 = scmp.ne.s32.totalorder %s1380_s1, %s992_s21  ;;  %s37_s18 = int_to_ptr.vmem [resolvable:$true] %s36_s18 }
   0x6   :  { %p996_p1 = scmp.lt.u32.totalorder %s992_s21, %s1380_s1 }
   0x8   :  { %p998_p2 = pnand %p996_p1, %p993_p0 }
   0xa   :  { %1001 = shalt.err (!%p998_p2)
}
   0xb   :  { %s1002_s26 = scalar_lea.vmem %s37_s18, 2048  ;;  %p1007_p4 = scmp.lt.s32.totalorder %s37_s18, %s37_s18 }
   0xc   :  { %p1003_p3 = scmp.ne.s32.totalorder %s37_s18, %s1002_s26  ;;  %p1008_p5 = scmp.lt.s32.totalorder %s1002_s26, %s1002_s26 }
   0xe   :  { %p1009_p6 = por %p1008_p5, %p1007_p4 }
  0x10   :  { %p1010_p7 = pnand %p1009_p6, %p1003_p3 }
  0x12   :  { %1013 = shalt.err (!%p1010_p7)
}
  0x13   :  { %s1157_s27 = smov 128   ;;  %s1158_s28 = smov 8  }
  0x14   :  { %42 = dma.hbm_to_vmem [thread:$0]  %s1380_s1, 2048, %s37_s18, [#allocation6], %s1157_s27, %s1157_s27, %s1158_s28  }
  0x15   :  { %s1159_s12 = smov [#allocation8]   ;;  %s1160_s14 = smov [#allocation2]  }
  0x16   :  { %s64_s13 = sshll.u32 %s1159_s12, 4  ;;  %s27_s15 = sshll.u32 %s1160_s14, 4  ;;  %s65_s13 = int_to_ptr.vmem [resolvable:$true] %s64_s13  ;;  %s28_s15 = int_to_ptr.vmem [resolvable:$true] %s27_s15 }
  0x17   :  { %s1014_s19 = scalar_lea.hbm %s1384_s5, 4096 }
  0x18   :  { %p1015_p8 = scmp.ne.s32.totalorder %s1384_s5, %s1014_s19  ;;  %p1018_p9 = scmp.lt.u32.totalorder %s1014_s19, %s1384_s5 }
  0x1a   :  { %p1020_p10 = pnand %p1018_p9, %p1015_p8 }
  0x1c   :  { %1023 = shalt.err (!%p1020_p10)
}
  0x1d   :  { %s1024_s1 = scalar_lea.vmem %s65_s13, 4096  ;;  %p1029_p12 = scmp.lt.s32.totalorder %s65_s13, %s65_s13 }
  0x1e   :  { %p1025_p11 = scmp.ne.s32.totalorder %s65_s13, %s1024_s1  ;;  %p1030_p13 = scmp.lt.s32.totalorder %s1024_s1, %s1024_s1 }
  0x20   :  { %p1031_p0 = por %p1030_p13, %p1029_p12 }
  0x22   :  { %p1032_p1 = pnand %p1031_p0, %p1025_p11 }
  0x24   :  { %1035 = shalt.err (!%p1032_p1)
}
  0x25   :  { %70 = dma.hbm_to_vmem [thread:$0]  %s1384_s5, 4096, %s65_s13, [#allocation9], %s1157_s27, %s1157_s27, %s1158_s28  }
  0x26   :  { %s1036_s29 = scalar_lea.hbm %s1379_s0, 128 }
  0x27   :  { %p1037_p2 = scmp.ne.s32.totalorder %s1379_s0, %s1036_s29  ;;  %p1040_p3 = scmp.lt.u32.totalorder %s1036_s29, %s1379_s0 }
  0x29   :  { %p1042_p4 = pnand %p1040_p3, %p1037_p2 }
  0x2b   :  { %1045 = shalt.err (!%p1042_p4)
}
  0x2c   :  { %s1046_s17 = scalar_lea.vmem %s28_s15, 128  ;;  %p1051_p6 = scmp.lt.s32.totalorder %s28_s15, %s28_s15 }
  0x2d   :  { %p1047_p5 = scmp.ne.s32.totalorder %s28_s15, %s1046_s17  ;;  %p1052_p7 = scmp.lt.s32.totalorder %s1046_s17, %s1046_s17 }
  0x2f   :  { %p1053_p8 = por %p1052_p7, %p1051_p6 }
  0x31   :  { %p1054_p9 = pnand %p1053_p8, %p1047_p5 }
  0x33   :  { %1057 = shalt.err (!%p1054_p9)
}
  0x34   :  { %30 = dma.hbm_to_vmem [thread:$0]  %s1379_s0, 128, %s28_s15, [#allocation3]  }
  0x35   :  { %s1161_s19 = smov [#allocation7]   ;;  %s1058_s23 = scalar_lea.hbm %s1382_s3, 4096 }
  0x36   :  { %s50_s20 = sshll.u32 %s1161_s19, 4  ;;  %p1059_p10 = scmp.ne.s32.totalorder %s1382_s3, %s1058_s23  ;;  %s51_s20 = int_to_ptr.vmem [resolvable:$true] %s50_s20 }
  0x37   :  { %p1062_p11 = scmp.lt.u32.totalorder %s1058_s23, %s1382_s3 }
  0x39   :  { %p1064_p12 = pnand %p1062_p11, %p1059_p10 }
  0x3b   :  { %1067 = shalt.err (!%p1064_p12)
}
  0x3c   :  { %s1068_s26 = scalar_lea.vmem %s51_s20, 4096  ;;  %p1073_p0 = scmp.lt.s32.totalorder %s51_s20, %s51_s20 }
  0x3d   :  { %p1069_p13 = scmp.ne.s32.totalorder %s51_s20, %s1068_s26  ;;  %p1074_p1 = scmp.lt.s32.totalorder %s1068_s26, %s1068_s26 }
  0x3f   :  { %p1075_p2 = por %p1074_p1, %p1073_p0 }
  0x41   :  { %p1076_p3 = pnand %p1075_p2, %p1069_p13 }
  0x43   :  { %1079 = shalt.err (!%p1076_p3)
}
  0x44   :  { %s1162_s0 = smov 256   ;;  %s1163_s15 = smov 16  }
  0x45   :  { %56 = dma.hbm_to_vmem [thread:$0]  %s1382_s3, 4096, %s51_s20, [#allocation6], %s1162_s0, %s1162_s0, %s1163_s15  }
  0x46   :  { %s1164_s12 = smov [#allocation10]   ;;  %s1165_s16 = smov [#allocation11]  }
  0x47   :  { %s78_s14 = sshll.u32 %s1164_s12, 4  ;;  %s92_s17 = sshll.u32 %s1165_s16, 4  ;;  %s79_s14 = int_to_ptr.vmem [resolvable:$true] %s78_s14  ;;  %s1284_s17 = int_to_ptr.vmem [resolvable:$true] %s92_s17 }
  0x48   :  { %s1080_s19 = scalar_lea.hbm %s1386_s7, 2048 }
  0x49   :  { %p1081_p4 = scmp.ne.s32.totalorder %s1386_s7, %s1080_s19  ;;  %p1084_p5 = scmp.lt.u32.totalorder %s1080_s19, %s1386_s7 }
  0x4b   :  { %p1086_p6 = pnand %p1084_p5, %p1081_p4 }
  0x4d   :  { %1089 = shalt.err (!%p1086_p6)
}
  0x4e   :  { %s1090_s3 = scalar_lea.vmem %s79_s14, 2048  ;;  %p1095_p8 = scmp.lt.s32.totalorder %s79_s14, %s79_s14 }
  0x4f   :  { %p1091_p7 = scmp.ne.s32.totalorder %s79_s14, %s1090_s3  ;;  %p1096_p9 = scmp.lt.s32.totalorder %s1090_s3, %s1090_s3 }
  0x51   :  { %p1097_p10 = por %p1096_p9, %p1095_p8 }
  0x53   :  { %p1098_p11 = pnand %p1097_p10, %p1091_p7 }
  0x55   :  { %1101 = shalt.err (!%p1098_p11)
}
  0x56   :  { %84 = dma.hbm_to_vmem [thread:$0]  %s1386_s7, 2048, %s79_s14, [#allocation9], %s1157_s27, %s1157_s27, %s1158_s28  }
  0x57   :  { %s1102_s26 = scalar_lea.hbm %s1388_s9, 2048 }
  0x58   :  { %p1103_p12 = scmp.ne.s32.totalorder %s1388_s9, %s1102_s26  ;;  %p1106_p13 = scmp.lt.u32.totalorder %s1102_s26, %s1388_s9 }
  0x5a   :  { %p1108_p0 = pnand %p1106_p13, %p1103_p12 }
  0x5c   :  { %1111 = shalt.err (!%p1108_p0)
}
  0x5d   :  { %s1112_s12 = scalar_lea.vmem %s1284_s17, 2048  ;;  %p1117_p2 = scmp.lt.s32.totalorder %s1284_s17, %s1284_s17 }
  0x5e   :  { %p1113_p1 = scmp.ne.s32.totalorder %s1284_s17, %s1112_s12  ;;  %p1118_p3 = scmp.lt.s32.totalorder %s1112_s12, %s1112_s12 }
  0x60   :  { %p1119_p4 = por %p1118_p3, %p1117_p2 }
  0x62   :  { %p1120_p5 = pnand %p1119_p4, %p1113_p1 }
  0x64   :  { %1123 = shalt.err (!%p1120_p5)
}
  0x65   :  { %98 = dma.hbm_to_vmem [thread:$0]  %s1388_s9, 2048, %s1284_s17, [#allocation12], %s1157_s27, %s1157_s27, %s1158_s28  }
  0x66   :  { %1146 = dma.done.wait [#allocation3], 128  }
  0x67   :  { %1147 = vsyncadd [#allocation3], 4294967168 }
  0x68   :  { %1148 = dma.done.wait [#allocation6], 6144  }
  0x69   :  { %1149 = vsyncadd [#allocation6], 4294961152 }
  0x6a   :  { %1150 = dma.done.wait [#allocation9], 6144  }
  0x6b   :  { %1151 = vsyncadd [#allocation9], 4294961152 }
  0x6c   :  { %1152 = dma.done.wait [#allocation12], 2048  }
  0x6d   :  { %1153 = vsyncadd [#allocation12], 4294965248  ;;  %v1166_v0 = vmov 0.0|0.0   ;;  %vm1167_vm0 = vmmov 0   ;;  %v1168_v1 = vmov 0.0   ;;  %v120_v2 = vld [vmem:[#allocation5] sm:$0xff] }
  0x6e   :  { %842 = vmatprep.subr.bf16.mxu0 %v1166_v0  ;;  %769 = vmatprep.mubr.msk.f32.mxu0 %vm1167_vm0, %v1168_v1  ;;  %v121_v3 = vld [vmem:[#allocation5 + $0x8] sm:$0xff]  ;;  %v122_v4 = vld [vmem:[#allocation5 + $0x10] sm:$0xff]  ;;  %v123_v6 = vld [vmem:[#allocation5 + $0x18] sm:$0xff]  ;;  %s1169_s19 = smov [#allocation13]  }
  0x6f   :  { %322 = vmatprep.mubr.f32.mxu1 %v1168_v1  ;;  %v843_v5 = vpack.c.bf16 %v121_v3, %v120_v2  ;;  %v846_v7 = vpack.c.bf16 %v123_v6, %v122_v4  ;;  %v124_v8 = vld [vmem:[#allocation5 + $0x20] sm:$0xff]  ;;  %v125_v9 = vld [vmem:[#allocation5 + $0x28] sm:$0xff]  ;;  %v126_v11 = vld [vmem:[#allocation5 + $0x30] sm:$0xff]  ;;  %s635_s21 = sshll.u32 %s1169_s19, 4  ;;  %s636_s21 = int_to_ptr.vmem [resolvable:$true] %s635_s21 }
  0x70   :  { %v215_v10 = vld [vmem:[#allocation7 + $0x8] sm:$0xff]  ;;  %v127_v12 = vld [vmem:[#allocation5 + $0x38] sm:$0xff]  ;;  %v214_v14 = vld [vmem:[#allocation7] sm:$0xff]  ;;  %v849_v16 = vpack.c.bf16 %v125_v9, %v124_v8  ;;  %s1124_s22 = scalar_lea.vmem %s636_s21, 128  ;;  %p1129_p7 = scmp.lt.s32.totalorder %s636_s21, %s636_s21 }
  0x71   :  { %844 = vmatpush3.bf16.msra.mxu0 %v843_v5  ;;  %v217_v13 = vld [vmem:[#allocation7 + $0x18] sm:$0xff]  ;;  %v216_v15 = vld [vmem:[#allocation7 + $0x10] sm:$0xff]  ;;  %v219_v19 = vld [vmem:[#allocation7 + $0x28] sm:$0xff]  ;;  %v852_v27 = vpack.c.bf16 %v127_v12, %v126_v11  ;;  %p1125_p6 = scmp.ne.s32.totalorder %s636_s21, %s1124_s22  ;;  %p1130_p8 = scmp.lt.s32.totalorder %s1124_s22, %s1124_s22 }
  0x72   :  { %845 = vmatprep.subr.bf16.mxu0 %v1166_v0  ;;  %v866_v17 = vpack.c.bf16 %v217_v13, %v215_v10  ;;  %v868_v18 = vpack.c.bf16 %v216_v15, %v214_v14  ;;  %v221_v20 = vld [vmem:[#allocation7 + $0x38] sm:$0xff]  ;;  %v218_v21 = vld [vmem:[#allocation7 + $0x20] sm:$0xff]  ;;  %v220_v23 = vld [vmem:[#allocation7 + $0x30] sm:$0xff] }
  0x73   :  { %v870_v22 = vpack.c.bf16 %v221_v20, %v219_v19  ;;  %v223_v24 = vld [vmem:[#allocation7 + $0x48] sm:$0xff]  ;;  %v225_v25 = vld [vmem:[#allocation7 + $0x58] sm:$0xff]  ;;  %v872_v26 = vpack.c.bf16 %v220_v23, %v218_v21  ;;  %v128_v28 = vld [vmem:[#allocation5 + $0x40] sm:$0xff]  ;;  %p1131_p9 = por %p1130_p8, %p1129_p7 }
  0x74   :  { %867 = vmatprep.subr.bf16.mxu1 %v866_v17  ;;  %v874_v29 = vpack.c.bf16 %v225_v25, %v223_v24  ;;  %v222_v30 = vld [vmem:[#allocation7 + $0x40] sm:$0xff]  ;;  %v224_v31 = vld [vmem:[#allocation7 + $0x50] sm:$0xff]  ;;  %v129_v32 = vld [vmem:[#allocation5 + $0x48] sm:$0xff] }
  0x75   :  { %847 = vmatpush3.bf16.msra.mxu0 %v846_v7  ;;  %869 = vmatpush1.bf16.msra.mxu1 %v868_v18  ;;  %v227_v33 = vld [vmem:[#allocation7 + $0x68] sm:$0xff]  ;;  %v229_v34 = vld [vmem:[#allocation7 + $0x78] sm:$0xff]  ;;  %v876_v35 = vpack.c.bf16 %v224_v31, %v222_v30  ;;  %v855_v36 = vpack.c.bf16 %v129_v32, %v128_v28  ;;  %v130_v37 = vld [vmem:[#allocation5 + $0x50] sm:$0xff]  ;;  %p1132_p10 = pnand %p1131_p9, %p1125_p6 }
  0x76   :  { %848 = vmatprep.subr.bf16.mxu0 %v1166_v0  ;;  %871 = vmatprep.subr.bf16.mxu1 %v870_v22  ;;  %v878_v38 = vpack.c.bf16 %v229_v34, %v227_v33  ;;  %v226_v39 = vld [vmem:[#allocation7 + $0x60] sm:$0xff]  ;;  %v228_v40 = vld [vmem:[#allocation7 + $0x70] sm:$0xff]  ;;  %v131_v41 = vld [vmem:[#allocation5 + $0x58] sm:$0xff] }
  0x77   :  { %v231_v42 = vld [vmem:[#allocation7 + $0x88] sm:$0xff]  ;;  %v233_v43 = vld [vmem:[#allocation7 + $0x98] sm:$0xff]  ;;  %v880_v44 = vpack.c.bf16 %v228_v40, %v226_v39  ;;  %v858_v45 = vpack.c.bf16 %v131_v41, %v130_v37  ;;  %v132_v46 = vld [vmem:[#allocation5 + $0x60] sm:$0xff] }
  0x78   :  { %v882_v47 = vpack.c.bf16 %v233_v43, %v231_v42  ;;  %v230_v48 = vld [vmem:[#allocation7 + $0x80] sm:$0xff]  ;;  %v232_v49 = vld [vmem:[#allocation7 + $0x90] sm:$0xff]  ;;  %v133_v50 = vld [vmem:[#allocation5 + $0x68] sm:$0xff] }
  0x79   :  { %850 = vmatpush3.bf16.msra.mxu0 %v849_v16  ;;  %873 = vmatpush1.bf16.msra.mxu1 %v872_v26  ;;  %v235_v51 = vld [vmem:[#allocation7 + $0xa8] sm:$0xff]  ;;  %v237_v52 = vld [vmem:[#allocation7 + $0xb8] sm:$0xff]  ;;  %v884_v53 = vpack.c.bf16 %v232_v49, %v230_v48  ;;  %v861_v54 = vpack.c.bf16 %v133_v50, %v132_v46  ;;  %v134_v55 = vld [vmem:[#allocation5 + $0x70] sm:$0xff] }
  0x7a   :  { %851 = vmatprep.subr.bf16.mxu0 %v1166_v0  ;;  %875 = vmatprep.subr.bf16.mxu1 %v874_v29  ;;  %v886_v56 = vpack.c.bf16 %v237_v52, %v235_v51  ;;  %v234_v57 = vld [vmem:[#allocation7 + $0xa0] sm:$0xff]  ;;  %v236_v58 = vld [vmem:[#allocation7 + $0xb0] sm:$0xff]  ;;  %v135_v59 = vld [vmem:[#allocation5 + $0x78] sm:$0xff] }
  0x7b   :  { %v239_v60 = vld [vmem:[#allocation7 + $0xc8] sm:$0xff]  ;;  %v241_v61 = vld [vmem:[#allocation7 + $0xd8] sm:$0xff]  ;;  %v888_v62 = vpack.c.bf16 %v236_v58, %v234_v57  ;;  %v864_v63 = vpack.c.bf16 %v135_v59, %v134_v55  ;;  %v238_v3 = vld [vmem:[#allocation7 + $0xc0] sm:$0xff] }
  0x7c   :  { %v890_v2 = vpack.c.bf16 %v241_v61, %v239_v60  ;;  %v240_v4 = vld [vmem:[#allocation7 + $0xd0] sm:$0xff]  ;;  %v119_v6 = vld [vmem:[#allocation2] sm:$0xff]  ;;  %v243_v7 = vld [vmem:[#allocation7 + $0xe8] sm:$0xff] }
  0x7d   :  { %853 = vmatpush3.bf16.msra.mxu0 %v852_v27  ;;  %877 = vmatpush1.bf16.msra.mxu1 %v876_v35  ;;  %v892_v5 = vpack.c.bf16 %v240_v4, %v238_v3  ;;  %v245_v8 = vld [vmem:[#allocation7 + $0xf8] sm:$0xff]  ;;  %v242_v10 = vld [vmem:[#allocation7 + $0xe0] sm:$0xff]  ;;  %v244_v11 = vld [vmem:[#allocation7 + $0xf0] sm:$0xff] }
  0x7e   :  { %854 = vmatprep.subr.bf16.mxu0 %v1166_v0  ;;  %879 = vmatprep.subr.bf16.mxu1 %v878_v38  ;;  %v894_v9 = vpack.c.bf16 %v245_v8, %v243_v7  ;;  %v896_v12 = vpack.c.bf16 %v244_v11, %v242_v10  ;;  %v347_v13 = vld [vmem:[#allocation8 + $0x80] sm:$0xff]  ;;  %v348_v14 = vld [vmem:[#allocation8 + $0x88] sm:$0xff]  ;;  %v349_v18 = vld [vmem:[#allocation8 + $0x90] sm:$0xff] }
  0x7f   :  { %v331_v15 = vld [vmem:[#allocation8] sm:$0xff]  ;;  %v898_v16 = vpack.c.bf16 %v348_v14, %v347_v13  ;;  %v332_v17 = vld [vmem:[#allocation8 + $0x8] sm:$0xff]  ;;  %v350_v19 = vld [vmem:[#allocation8 + $0x98] sm:$0xff] }
  0x80   :  { %v900_v20 = vpack.c.bf16 %v332_v17, %v331_v15  ;;  %v902_v21 = vpack.c.bf16 %v350_v19, %v349_v18  ;;  %v333_v22 = vld [vmem:[#allocation8 + $0x10] sm:$0xff]  ;;  %v334_v23 = vld [vmem:[#allocation8 + $0x18] sm:$0xff]  ;;  %v351_v24 = vld [vmem:[#allocation8 + $0xa0] sm:$0xff] }
  0x81   :  { %856 = vmatpush3.bf16.msra.mxu0 %v855_v36  ;;  %881 = vmatpush1.bf16.msra.mxu1 %v880_v44  ;;  %v352_v25 = vld [vmem:[#allocation8 + $0xa8] sm:$0xff]  ;;  %v904_v26 = vpack.c.bf16 %v334_v23, %v333_v22  ;;  %v335_v28 = vld [vmem:[#allocation8 + $0x20] sm:$0xff]  ;;  %v353_v30 = vld [vmem:[#allocation8 + $0xb0] sm:$0xff]  ;;  %v248_v22 = vlaneseq }
  0x82   :  { %857 = vmatprep.subr.bf16.mxu0 %v1166_v0  ;;  %883 = vmatprep.subr.bf16.mxu1 %v882_v47  ;;  %v906_v27 = vpack.c.bf16 %v352_v25, %v351_v24  ;;  %v336_v29 = vld [vmem:[#allocation8 + $0x28] sm:$0xff]  ;;  %v354_v31 = vld [vmem:[#allocation8 + $0xb8] sm:$0xff]  ;;  %v337_v34 = vld [vmem:[#allocation8 + $0x30] sm:$0xff] }
  0x83   :  { %v908_v32 = vpack.c.bf16 %v336_v29, %v335_v28  ;;  %v910_v33 = vpack.c.bf16 %v354_v31, %v353_v30  ;;  %v338_v35 = vld [vmem:[#allocation8 + $0x38] sm:$0xff]  ;;  %v355_v36 = vld [vmem:[#allocation8 + $0xc0] sm:$0xff]  ;;  %v356_v37 = vld [vmem:[#allocation8 + $0xc8] sm:$0xff]  ;;  %v249_v23 = vshrl.u32 %v248_v22, 7 }
  0x84   :  { %v912_v38 = vpack.c.bf16 %v338_v35, %v337_v34  ;;  %v914_v39 = vpack.c.bf16 %v356_v37, %v355_v36  ;;  %v339_v40 = vld [vmem:[#allocation8 + $0x40] sm:$0xff]  ;;  %v340_v41 = vld [vmem:[#allocation8 + $0x48] sm:$0xff]  ;;  %v357_v42 = vld [vmem:[#allocation8 + $0xd0] sm:$0xff] }
  0x85   :  { %859 = vmatpush3.bf16.msra.mxu0 %v858_v45  ;;  %885 = vmatpush1.bf16.msra.mxu1 %v884_v53  ;;  %v358_v43 = vld [vmem:[#allocation8 + $0xd8] sm:$0xff]  ;;  %v916_v44 = vpack.c.bf16 %v340_v41, %v339_v40  ;;  %v341_v46 = vld [vmem:[#allocation8 + $0x50] sm:$0xff]  ;;  %v359_v48 = vld [vmem:[#allocation8 + $0xe0] sm:$0xff]  ;;  %v250_v24 = vsub.s32 0, %v249_v23 }
  0x86   :  { %860 = vmatprep.subr.bf16.mxu0 %v1166_v0  ;;  %887 = vmatprep.subr.bf16.mxu1 %v886_v56  ;;  %v918_v45 = vpack.c.bf16 %v358_v43, %v357_v42  ;;  %v342_v47 = vld [vmem:[#allocation8 + $0x58] sm:$0xff]  ;;  %v360_v49 = vld [vmem:[#allocation8 + $0xe8] sm:$0xff]  ;;  %v343_v57 = vld [vmem:[#allocation8 + $0x60] sm:$0xff] }
  0x87   :  { %v920_v50 = vpack.c.bf16 %v342_v47, %v341_v46  ;;  %v922_v51 = vpack.c.bf16 %v360_v49, %v359_v48  ;;  %v647_v52 = vld [vmem:[%s1381_s2] ss:$0 sm:$0xff]  ;;  %v344_v58 = vld [vmem:[#allocation8 + $0x68] sm:$0xff]  ;;  %v361_v60 = vld [vmem:[#allocation8 + $0xf0] sm:$0xff] }
  0x88   :  { %v924_v59 = vpack.c.bf16 %v344_v58, %v343_v57  ;;  %v362_v61 = vld [vmem:[#allocation8 + $0xf8] sm:$0xff]  ;;  %v441_v4 = vld [vmem:[#allocation10] sm:$0xff]  ;;  %v446_v11 = vld [vmem:[#allocation10 + $0x28] sm:$0xff] }
  0x89   :  { %862 = vmatpush3.bf16.msra.mxu0 %v861_v54  ;;  %889 = vmatpush1.bf16.msra.mxu1 %v888_v62  ;;  %v926_v62 = vpack.c.bf16 %v362_v61, %v361_v60  ;;  %v444_v8 = vld [vmem:[#allocation10 + $0x18] sm:$0xff]  ;;  %v445_v10 = vld [vmem:[#allocation10 + $0x20] sm:$0xff]  ;;  %v447_v13 = vld [vmem:[#allocation10 + $0x30] sm:$0xff] }
  0x8a   :  { %863 = vmatprep.subr.bf16.mxu0 %v1166_v0  ;;  %891 = vmatprep.subr.bf16.mxu1 %v890_v2  ;;  %v346_v2 = vld [vmem:[#allocation8 + $0x78] sm:$0xff]  ;;  %v450_v17 = vld [vmem:[#allocation10 + $0x48] sm:$0xff]  ;;  %v451_v19 = vld [vmem:[#allocation10 + $0x50] sm:$0xff] }
  0x8b   :  { %v448_v14 = vld [vmem:[#allocation10 + $0x38] sm:$0xff]  ;;  %v453_v35 = vld [vmem:[#allocation10 + $0x60] sm:$0xff]  ;;  %v454_v36 = vld [vmem:[#allocation10 + $0x68] sm:$0xff] }
  0x8c   :  { %v940_v15 = vpack.c.bf16 %v448_v14, %v447_v13  ;;  %v246_v25 = vld [vmem:[%s1383_s4] sm:$0x3]  ;;  %v949_v37 = vpack.c.bf16 %v454_v36, %v453_v35  ;;  %v535_v41 = vld [vmem:[#allocation11] sm:$0xff]  ;;  %v536_v42 = vld [vmem:[#allocation11 + $0x8] sm:$0xff] }
  0x8d   :  { %865 = vmatpush3.bf16.msra.mxu0 %v864_v63  ;;  %893 = vmatpush1.bf16.msra.mxu1 %v892_v5  ;;  %v345_v63 = vld [vmem:[#allocation8 + $0x70] sm:$0xff]  ;;  %v442_v5 = vld [vmem:[#allocation10 + $0x8] sm:$0xff]  ;;  %v547_v58 = vld [vmem:[#allocation11 + $0x60] sm:$0xff] }
  0x8e   :  { %895 = vmatprep.subr.bf16.mxu1 %v894_v9  ;;  %899 = vmatprep.subr.bf16.mxu0 %v898_v16  ;;  %v928_v3 = vpack.c.bf16 %v346_v2, %v345_v63  ;;  %v931_v7 = vpack.c.bf16 %v442_v5, %v441_v4  ;;  %v449_v16 = vld [vmem:[#allocation10 + $0x40] sm:$0xff]  ;;  %v537_v43 = vld [vmem:[#allocation11 + $0x10] sm:$0xff]  ;;  %v540_v47 = vld [vmem:[#allocation11 + $0x28] sm:$0xff] }
  0x8f   :  { %v943_v18 = vpack.c.bf16 %v450_v17, %v449_v16  ;;  %v541_v49 = vld [vmem:[#allocation11 + $0x30] sm:$0xff] }
  0x90   :  { %770 = vmatmul.mubr.f32.vlgmr.msra.gmra.mrb[0].mxu0 %v119_v6  ;;  %v443_v6 = vld [vmem:[#allocation10 + $0x10] sm:$0xff] }
  0x91   :  { %897 = vmatpush1.bf16.msra.mxu1 %v896_v12  ;;  %901 = vmatpush3.bf16.msra.mxu0 %v900_v20  ;;  %v934_v9 = vpack.c.bf16 %v444_v8, %v443_v6  ;;  %v937_v12 = vpack.c.bf16 %v446_v11, %v445_v10  ;;  %v452_v20 = vld [vmem:[#allocation10 + $0x58] sm:$0xff]  ;;  %v549_v5 = vld [vmem:[#allocation11 + $0x70] sm:$0xff] }
  0x92   :  { %930 = vmatprep.subr.bf16.mxu1 %v1166_v0  ;;  %903 = vmatprep.subr.bf16.mxu0 %v902_v21  ;;  %v946_v21 = vpack.c.bf16 %v452_v20, %v451_v19  ;;  %v550_v6 = vld [vmem:[#allocation11 + $0x78] sm:$0xff] }
  0x93   :  { %v649_v8 = vld [vmem:[%s1387_s8] ss:$0 sm:$0xff] }
  0x95   :  { %905 = vmatpush3.bf16.msra.mxu0 %v904_v26  ;;  %v254_v26 = vsub.s32 1, %v249_v23 }
  0x96   :  { %907 = vmatprep.subr.bf16.mxu0 %v906_v27  ;;  %v251_v27 = vrot.slane %v246_v25, %v250_v24 }
  0x97   :  { %v255_v28 = vrot.slane %v246_v25, %v254_v26 }
  0x99   :  { %909 = vmatpush3.bf16.msra.mxu0 %v908_v32 }
  0x9a   :  { %911 = vmatprep.subr.bf16.mxu0 %v910_v33 }
  0x9d   :  { %913 = vmatpush3.bf16.msra.mxu0 %v912_v38  ;;  %v455_v38 = vld [vmem:[#allocation10 + $0x70] sm:$0xff] }
  0x9e   :  { %915 = vmatprep.subr.bf16.mxu0 %v914_v39  ;;  %v456_v39 = vld [vmem:[#allocation10 + $0x78] sm:$0xff] }
  0x9f   :  { %v952_v40 = vpack.c.bf16 %v456_v39, %v455_v38 }
  0xa1   :  { %917 = vmatpush3.bf16.msra.mxu0 %v916_v44  ;;  %v955_v44 = vpack.c.bf16 %v536_v42, %v535_v41 }
  0xa2   :  { %919 = vmatprep.subr.bf16.mxu0 %v918_v45  ;;  %v538_v45 = vld [vmem:[#allocation11 + $0x18] sm:$0xff] }
  0xa3   :  { %v958_v46 = vpack.c.bf16 %v538_v45, %v537_v43 }
  0xa5   :  { %921 = vmatpush3.bf16.msra.mxu0 %v920_v50  ;;  %v542_v50 = vld [vmem:[#allocation11 + $0x38] sm:$0xff] }
  0xa6   :  { %923 = vmatprep.subr.bf16.mxu0 %v922_v51  ;;  %v964_v51 = vpack.c.bf16 %v542_v50, %v541_v49 }
  0xa9   :  { %925 = vmatpush3.bf16.msra.mxu0 %v924_v59  ;;  %v548_v59 = vld [vmem:[#allocation11 + $0x68] sm:$0xff] }
  0xaa   :  { %927 = vmatprep.subr.bf16.mxu0 %v926_v62  ;;  %v973_v60 = vpack.c.bf16 %v548_v59, %v547_v58  ;;  %v648_v62 = vld [vmem:[%s1385_s6] ss:$0 sm:$0xff] }
  0xad   :  { %929 = vmatpush3.bf16.msra.mxu0 %v928_v3 }
  0xae   :  { %954 = vmatprep.subr.bf16.mxu0 %v1166_v0 }
 0x163   :  { %v209_v53 = vpop.f32.mrb[0].mxu0 }
 0x164   :  { %v210_v54 = vadd.f32 %v647_v52, %v209_v53  ;;  %v771_v55 = vpop.f32.mrb[1].mxu0  ;;  %v543_v52 = vld [vmem:[#allocation11 + $0x40] sm:$0xff]  ;;  %v544_v53 = vld [vmem:[#allocation11 + $0x48] sm:$0xff] }
 0x165   :  { %v545_v55 = vld [vmem:[#allocation11 + $0x50] sm:$0xff] }
 0x166   :  { %v213_v56 = vmax.f32 %v210_v54, 0.0  ;;  %v967_v54 = vpack.c.bf16 %v544_v53, %v543_v52 }
 0x168   :  { %323 = vmatmul.mubr.f32.vlgmr.msra.gmra.mrb[0].mxu1 %v213_v56  ;;  %v546_v56 = vld [vmem:[#allocation11 + $0x58] sm:$0xff] }
 0x169   :  { %804 = vmatprep.mubr.msk.f32.mxu1 %vm1167_vm0, %v1168_v1  ;;  %932 = vmatpush3.bf16.msra.mxu1 %v931_v7  ;;  %v970_v57 = vpack.c.bf16 %v546_v56, %v545_v55  ;;  %v976_v7 = vpack.c.bf16 %v550_v6, %v549_v5 }
 0x16a   :  { %933 = vmatprep.subr.bf16.mxu1 %v1166_v0 }
 0x16d   :  { %935 = vmatpush3.bf16.msra.mxu1 %v934_v9 }
 0x16e   :  { %936 = vmatprep.subr.bf16.mxu1 %v1166_v0 }
 0x171   :  { %938 = vmatpush3.bf16.msra.mxu1 %v937_v12  ;;  %v650_v12 = vld [vmem:[%s1389_s10] ss:$0 sm:$0xff] }
 0x172   :  { %939 = vmatprep.subr.bf16.mxu1 %v1166_v0 }
 0x175   :  { %941 = vmatpush3.bf16.msra.mxu1 %v940_v15 }
 0x176   :  { %942 = vmatprep.subr.bf16.mxu1 %v1166_v0 }
 0x179   :  { %944 = vmatpush3.bf16.msra.mxu1 %v943_v18 }
 0x17a   :  { %945 = vmatprep.subr.bf16.mxu1 %v1166_v0 }
 0x17d   :  { %947 = vmatpush3.bf16.msra.mxu1 %v946_v21 }
 0x17e   :  { %948 = vmatprep.subr.bf16.mxu1 %v1166_v0 }
 0x181   :  { %950 = vmatpush3.bf16.msra.mxu1 %v949_v37 }
 0x182   :  { %951 = vmatprep.subr.bf16.mxu1 %v1166_v0 }
 0x185   :  { %953 = vmatpush3.bf16.msra.mxu1 %v952_v40 }
 0x23b   :  { %v324_v29 = vpop.f32.mrb[0].mxu1 }
 0x23c   :  { %v325_v30 = vadd.f32 %v324_v29, %v251_v27  ;;  %v326_v31 = vpop.f32.mrb[1].mxu1 }
 0x23d   :  { %v327_v32 = vadd.f32 %v326_v31, %v255_v28 }
 0x23e   :  { %v329_v34 = vmax.f32 %v325_v30, 0.0 }
 0x23f   :  { %v330_v33 = vmax.f32 %v327_v32, 0.0 }
 0x241   :  { %434 = vmatprep.mubr.f32.mxu0 %v330_v33 }
 0x242   :  { %435 = vmatmul.mubr.f32.vlgmr.msra.gmra.mrb[2].mxu0 %v329_v34 }
 0x243   :  { %839 = vmatprep.mubr.msk.f32.mxu0 %vm1167_vm0, %v1168_v1  ;;  %956 = vmatpush3.bf16.msra.mxu0 %v955_v44  ;;  %v539_v1 = vld [vmem:[#allocation11 + $0x20] sm:$0xff] }
 0x244   :  { %957 = vmatprep.subr.bf16.mxu0 %v1166_v0  ;;  %v961_v48 = vpack.c.bf16 %v540_v47, %v539_v1 }
 0x247   :  { %959 = vmatpush3.bf16.msra.mxu0 %v958_v46 }
 0x248   :  { %960 = vmatprep.subr.bf16.mxu0 %v1166_v0 }
 0x24b   :  { %962 = vmatpush3.bf16.msra.mxu0 %v961_v48 }
 0x24c   :  { %963 = vmatprep.subr.bf16.mxu0 %v1166_v0 }
 0x24f   :  { %965 = vmatpush3.bf16.msra.mxu0 %v964_v51 }
 0x250   :  { %966 = vmatprep.subr.bf16.mxu0 %v1166_v0 }
 0x253   :  { %968 = vmatpush3.bf16.msra.mxu0 %v967_v54 }
 0x254   :  { %969 = vmatprep.subr.bf16.mxu0 %v1166_v0 }
 0x257   :  { %971 = vmatpush3.bf16.msra.mxu0 %v970_v57 }
 0x258   :  { %972 = vmatprep.subr.bf16.mxu0 %v1166_v0 }
 0x25b   :  { %974 = vmatpush3.bf16.msra.mxu0 %v973_v60 }
 0x25c   :  { %975 = vmatprep.subr.bf16.mxu0 %v1166_v0 }
 0x25f   :  { %977 = vmatpush3.bf16.msra.mxu0 %v976_v7 }
 0x315   :  { %v700_v61 = vpop.f32.mrb[2].mxu0 }
 0x316   :  { %v701_v63 = vpop.f32.mrb[3].mxu0 }
 0x317   :  { %v702_v2 = vadd.f32 %v701_v63, %v700_v61 }
 0x319   :  { %v437_v3 = vadd.f32 %v702_v2, %v648_v62 }
 0x31b   :  { %v440_v4 = vmax.f32 %v437_v3, 0.0 }
 0x31d   :  { %805 = vmatmul.mubr.f32.vlgmr.msra.gmra.mrb[2].mxu1 %v440_v4 }
 0x3f0   :  { %v530_v9 = vpop.f32.mrb[2].mxu1 }
 0x3f1   :  { %v531_v0 = vadd.f32 %v649_v8, %v530_v9  ;;  %v806_v10 = vpop.f32.mrb[3].mxu1 }
 0x3f3   :  { %v534_v11 = vmax.f32 %v531_v0, 0.0 }
 0x3f5   :  { %840 = vmatmul.mubr.f32.vlgmr.msra.gmra.mrb[4].mxu0 %v534_v11 }
 0x4c8   :  { %v624_v13 = vpop.f32.mrb[4].mxu0 }
 0x4c9   :  { %v625_v14 = vadd.f32 %v650_v12, %v624_v13  ;;  %v841_v15 = vpop.f32.mrb[5].mxu0 }
 0x4cb   :  { %628 = vst [vmem:[#allocation13] sm:$0xff] %v625_v14 }
 0x4cc   :  { %1135 = shalt.err (!%p1132_p10)
}
 0x4cd   :  { %s1136_s1 = scalar_lea.hbm %s1390_s11, 128 }
 0x4ce   :  { %p1137_p11 = scmp.ne.s32.totalorder %s1390_s11, %s1136_s1  ;;  %p1140_p12 = scmp.lt.u32.totalorder %s1136_s1, %s1390_s11 }
 0x4d0   :  { %p1142_p13 = pnand %p1140_p12, %p1137_p11 }
 0x4d2   :  { %1145 = shalt.err (!%p1142_p13)
}
 0x4d3   :  { %638 = dma.vmem_to_hbm [thread:$0]  %s636_s21, 128, %s1390_s11, [#allocation4]  }
 0x4d4   :  { %1154 = dma.done.wait [#allocation4], 128  }
 0x4d5   :  { %1155 = vsyncadd [#allocation4], 4294967168 }
 0x4d6   :  { %642 = vsyncpa [#allocation3], 1 }
 0x4d7   :  { %643 = vsyncpa [#allocation6], 1 }
 0x4d8   :  { %644 = vsyncpa [#allocation9], 1 }
 0x4d9   :  { %645 = vsyncpa [#allocation12], 1 }
 0x4da   :  { %646 = vsyncpa [#allocation4], 1 }

</bundles_post_ra>
